<compile_context>
chip_gen: v7x
topology: tpu7x:2x2x1
jax: 0.10.0
libtpu: 0.0.40
codegen_flags: <defaults>
</compile_context>

<pallas_src>
import functools

import jax
import jax.numpy as jnp
from jax.experimental import pallas as pl
from jax.experimental.pallas import tpu as pltpu

BN_EPS = 1e-5
_LANE = 128
_SUBLANE = 8


def _round_up(x, m):
    return ((x + m - 1) // m) * m


def _pick_n_tile(n, target=512):
    """Largest multiple-of-8 divisor of n not exceeding `target` (or n itself)."""
    if n <= target:
        return n
    t = (target // _SUBLANE) * _SUBLANE
    while t >= _SUBLANE:
        if n % t == 0:
            return t
        t -= _SUBLANE
    return n


def _mtl3_kernel(x_ref, w1_ref, b1_ref, w2_ref, b2_ref, w3_ref, b3_ref,
                 w4_ref, b4_ref, out_ref):
    """One grid step == one N-tile covering ALL tasks."""
    T, nt, F = x_ref.shape

    # Shared trunk: fold the task axis into the batch so each layer is ONE
    # (T*nt)-row matmul instead of T tiny ones.  x stays f32 through the
    # reshape (clean sublane-merge layout), then is cast for the MXU.
    x2d = x_ref[...].reshape(T * nt, F).astype(w1_ref.dtype)

    h = jnp.dot(x2d, w1_ref[...], preferred_element_type=jnp.float32) + b1_ref[...]
    h = jnp.maximum(h, 0.0)

    # (eval-mode BatchNorm1d has been folded into w2/b2 by the wrapper)
    h = jnp.dot(h.astype(w2_ref.dtype), w2_ref[...],
                preferred_element_type=jnp.float32) + b2_ref[...]
    h = jnp.maximum(h, 0.0)

    h = jnp.dot(h.astype(w3_ref.dtype), w3_ref[...],
                preferred_element_type=jnp.float32) + b3_ref[...]
    h = jnp.maximum(h, 0.0)

    # Per-task heads (single Linear each): small static unroll over tasks.
    for t in range(T):
        ht = h[t * nt:(t + 1) * nt, :].astype(w4_ref.dtype)
        ot = jnp.dot(ht, w4_ref[t], preferred_element_type=jnp.float32) + b4_ref[t]
        out_ref[t] = ot.astype(out_ref.dtype)


@functools.partial(jax.jit, static_argnames=("tasks_num", "use_bf16"))
def mtlnet_3shared_forward(x, params, tasks_num, use_bf16=True):
    """x: [tasks_num, N, feature_size]  ->  stacked outputs [tasks_num, N, output_size]."""
    (w1, b1, gamma, beta, rmean, rvar, w2, b2, w3, b3, w4, b4) = params
    T, N, F = x.shape
    S = w1.shape[1]     # shared_layer_size
    H1 = w2.shape[1]    # tower_h1
    H2 = w3.shape[1]    # tower_h2
    O = w4.shape[2]     # output_size
    assert T == tasks_num

    # ---- Host/XLA-side preprocessing (runs once, outside the kernel) ----
    # 1) Fold eval-mode BatchNorm into the second shared Linear:
    #    bn(h) = h*s + c,  s = gamma*rsqrt(var+eps),  c = beta - mean*s
    #    => bn(h) @ W2 + b2 == h @ (s[:,None]*W2) + (c @ W2 + b2)
    s = gamma * jax.lax.rsqrt(rvar + BN_EPS)          # (1, S)
    c = beta - rmean * s                              # (1, S)
    w2_f = w2 * s.reshape(S, 1)                       # scale W2's input rows
    b2_f = b2 + c @ w2                                # (1, H1)

    # 2) Pad batch to a sublane multiple and the head output to a lane multiple
    #    (lane-dense stores); padded rows/cols are sliced off below.
    N_pad = _round_up(N, _SUBLANE)
    if N_pad != N:
        x = jnp.pad(x, ((0, 0), (0, N_pad - N), (0, 0)))
    O_pad = _round_up(O, _LANE)
    w4_p = jnp.pad(w4, ((0, 0), (0, 0), (0, O_pad - O))) if O_pad != O else w4
    b4_p = jnp.pad(b4, ((0, 0), (0, 0), (0, O_pad - O))) if O_pad != O else b4

    # 3) MXU operands (weights) in bf16; biases stay f32 so bias/ReLU epilogues
    #    run on the f32 VPU path.
    mxu_dtype = jnp.bfloat16 if use_bf16 else jnp.float32
    w1_m = w1.astype(mxu_dtype)
    w2_m = w2_f.astype(mxu_dtype)
    w3_m = w3.astype(mxu_dtype)
    w4_m = w4_p.astype(mxu_dtype)

    n_tile = _pick_n_tile(N_pad)
    grid = (N_pad // n_tile,)

    out_p = pl.pallas_call(
        _mtl3_kernel,
        out_shape=jax.ShapeDtypeStruct((T, N_pad, O_pad), jnp.float32),
        grid=grid,
        in_specs=[
            pl.BlockSpec((T, n_tile, F), lambda n: (0, n, 0)),     # x N-tile (all tasks)
            pl.BlockSpec((F, S), lambda n: (0, 0)),                # W1 (shared)
            pl.BlockSpec((1, S), lambda n: (0, 0)),                # b1
            pl.BlockSpec((S, H1), lambda n: (0, 0)),               # W2 (BN folded in)
            pl.BlockSpec((1, H1), lambda n: (0, 0)),               # b2 (BN folded in)
            pl.BlockSpec((H1, H2), lambda n: (0, 0)),              # W3 (shared)
            pl.BlockSpec((1, H2), lambda n: (0, 0)),               # b3
            pl.BlockSpec((T, H2, O_pad), lambda n: (0, 0, 0)),     # W4 (per-task heads)
            pl.BlockSpec((T, 1, O_pad), lambda n: (0, 0, 0)),      # b4 (per-task heads)
        ],
        out_specs=pl.BlockSpec((T, n_tile, O_pad), lambda n: (0, n, 0)),
        compiler_params=pltpu.CompilerParams(
            dimension_semantics=("parallel",)),   # N-tiles split evenly across cores
    )(x, w1_m, b1, w2_m, b2_f, w3_m, b3, w4_m, b4_p)

    return out_p[:, :N, :O]


def init_params(key, feature_size, shared_layer_size, tower_h1, tower_h2,
                tasks_num, output_size):
    """Deterministic synthetic init (PyTorch-Linear-style uniform bounds)."""
    ks = jax.random.split(key, 12)

    def lin(kw, kb, fan_in, fan_out, batch_shape=()):
        bound = 1.0 / jnp.sqrt(float(fan_in))
        w = jax.random.uniform(kw, batch_shape + (fan_in, fan_out),
                               jnp.float32, -bound, bound)
        b = jax.random.uniform(kb, batch_shape + (1, fan_out),
                               jnp.float32, -bound, bound)
        return w, b

    w1, b1 = lin(ks[0], ks[1], feature_size, shared_layer_size)

    # BatchNorm1d params (non-trivial so the BN-fold path is exercised)
    gamma = 1.0 + 0.1 * jax.random.normal(ks[2], (1, shared_layer_size), jnp.float32)
    beta = 0.1 * jax.random.normal(ks[3], (1, shared_layer_size), jnp.float32)
    rmean = 0.1 * jax.random.normal(ks[4], (1, shared_layer_size), jnp.float32)
    rvar = 1.0 + 0.1 * jax.random.uniform(ks[5], (1, shared_layer_size), jnp.float32)

    w2, b2 = lin(ks[6], ks[7], shared_layer_size, tower_h1)
    w3, b3 = lin(ks[8], ks[9], tower_h1, tower_h2)
    # Per-task towers: single Linear(tower_h2 -> output_size) each.
    w4, b4 = lin(ks[10], ks[11], tower_h2, output_size, batch_shape=(tasks_num,))

    return (w1, b1, gamma, beta, rmean, rvar, w2, b2, w3, b3, w4, b4)


def reference_forward(x, params):
    """Pure-JAX reference matching the PyTorch MTLnet_3shared eval-mode forward."""
    (w1, b1, gamma, beta, rmean, rvar, w2, b2, w3, b3, w4, b4) = params
    outs = []
    for i in range(x.shape[0]):
        h = jnp.maximum(x[i] @ w1 + b1, 0.0)
        h = (h - rmean) / jnp.sqrt(rvar + BN_EPS) * gamma + beta
        h = jnp.maximum(h @ w2 + b2, 0.0)
        h = jnp.maximum(h @ w3 + b3, 0.0)
        outs.append(h @ w4[i] + b4[i])
    return jnp.stack(outs, axis=0)


if __name__ == "__main__":
    # Small shapes consistent with the module's __init__.
    feature_size = 32
    shared_layer_size = 64
    tower_h1 = 32
    tower_h2 = 16
    output_size = 8
    tasks_num = 3
    batch = 8

    key = jax.random.PRNGKey(0)
    kx, kp = jax.random.split(key)

    # layout: [tasks_num, batch, feature_size]
    x = jax.random.normal(kx, (tasks_num, batch, feature_size), jnp.float32)
    params = init_params(kp, feature_size, shared_layer_size, tower_h1,
                         tower_h2, tasks_num, output_size)

    out = mtlnet_3shared_forward(x, params, tasks_num)
    out = jax.block_until_ready(out)

    ref = reference_forward(x, params)
    assert out.shape == (tasks_num, batch, output_size)
    # bf16 MXU operands (f32 accumulation) => tolerance sized for bf16 rounding.
    assert jnp.allclose(out, ref, atol=5e-2, rtol=5e-2), "mismatch vs reference"

    # PyTorch forward returns a list of per-task outputs:
    outs_list = [out[i] for i in range(tasks_num)]
    assert len(outs_list) == tasks_num

    print("KERNEL_OK")
</pallas_src>

<mosaic_0001>
module attributes {stable_mosaic.version = 11 : i64} {
  func.func @_mtl3_kernel(%arg0: i32, %arg1: memref<3x8x32xf32, #tpu.memory_space<vmem>>, %arg2: memref<32x64xbf16, #tpu.memory_space<vmem>>, %arg3: memref<1x64xf32, #tpu.memory_space<vmem>>, %arg4: memref<64x32xbf16, #tpu.memory_space<vmem>>, %arg5: memref<1x32xf32, #tpu.memory_space<vmem>>, %arg6: memref<32x16xbf16, #tpu.memory_space<vmem>>, %arg7: memref<1x16xf32, #tpu.memory_space<vmem>>, %arg8: memref<3x16x128xbf16, #tpu.memory_space<vmem>>, %arg9: memref<3x1x128xf32, #tpu.memory_space<vmem>>, %arg10: memref<3x8x128xf32, #tpu.memory_space<vmem>>) attributes {dimension_semantics = [#tpu.dimension_semantics<parallel>], iteration_bounds = array<i64: 1>, scalar_prefetch = 0 : i64, scratch_operands = 0 : i64, tpu.core_type = #tpu.core_type<tc>, window_params = [{transform_indices = @transform_0, window_bounds = array<i64: 3, 8, 32>}, {pipeline_mode = #tpu.pipeline_mode<synchronous>, transform_indices = @transform_1, window_bounds = array<i64: 32, 64>}, {pipeline_mode = #tpu.pipeline_mode<synchronous>, transform_indices = @transform_2, window_bounds = array<i64: 1, 64>}, {pipeline_mode = #tpu.pipeline_mode<synchronous>, transform_indices = @transform_3, window_bounds = array<i64: 64, 32>}, {pipeline_mode = #tpu.pipeline_mode<synchronous>, transform_indices = @transform_4, window_bounds = array<i64: 1, 32>}, {pipeline_mode = #tpu.pipeline_mode<synchronous>, transform_indices = @transform_5, window_bounds = array<i64: 32, 16>}, {pipeline_mode = #tpu.pipeline_mode<synchronous>, transform_indices = @transform_6, window_bounds = array<i64: 1, 16>}, {pipeline_mode = #tpu.pipeline_mode<synchronous>, transform_indices = @transform_7, window_bounds = array<i64: 3, 16, 128>}, {pipeline_mode = #tpu.pipeline_mode<synchronous>, transform_indices = @transform_8, window_bounds = array<i64: 3, 1, 128>}, {transform_indices = @transform_9, window_bounds = array<i64: 3, 8, 128>}]} {
    %c0 = arith.constant 0 : index
    %c0_0 = arith.constant 0 : index
    %c0_1 = arith.constant 0 : index
    %0 = vector.load %arg1[%c0, %c0_0, %c0_1] : memref<3x8x32xf32, #tpu.memory_space<vmem>>, vector<3x8x32xf32>
    %1 = vector.shape_cast %0 : vector<3x8x32xf32> to vector<24x32xf32>
    %2 = arith.truncf %1 : vector<24x32xf32> to vector<24x32xbf16>
    %c0_2 = arith.constant 0 : index
    %c0_3 = arith.constant 0 : index
    %3 = vector.load %arg2[%c0_2, %c0_3] : memref<32x64xbf16, #tpu.memory_space<vmem>>, vector<32x64xbf16>
    %cst = arith.constant dense<0.000000e+00> : vector<24x64xf32>
    %4 = tpu.matmul %2, %3, %cst {dimension_numbers = #tpu.dot_dimension_numbers<[1], [0], [0], [1], [0, 0, 1, 1], [], []>} : vector<24x32xbf16>, vector<32x64xbf16>, vector<24x64xf32> -> vector<24x64xf32>
    %c0_4 = arith.constant 0 : index
    %c0_5 = arith.constant 0 : index
    %5 = vector.load %arg3[%c0_4, %c0_5] : memref<1x64xf32, #tpu.memory_space<vmem>>, vector<1x64xf32>
    %6 = vector.broadcast %5 : vector<1x64xf32> to vector<24x64xf32>
    %7 = arith.addf %4, %6 : vector<24x64xf32>
    %cst_6 = arith.constant 0.000000e+00 : f32
    %8 = vector.broadcast %cst_6 : f32 to vector<24x64xf32>
    %9 = arith.maximumf %7, %8 : vector<24x64xf32>
    %10 = arith.truncf %9 : vector<24x64xf32> to vector<24x64xbf16>
    %c0_7 = arith.constant 0 : index
    %c0_8 = arith.constant 0 : index
    %11 = vector.load %arg4[%c0_7, %c0_8] : memref<64x32xbf16, #tpu.memory_space<vmem>>, vector<64x32xbf16>
    %cst_9 = arith.constant dense<0.000000e+00> : vector<24x32xf32>
    %12 = tpu.matmul %10, %11, %cst_9 {dimension_numbers = #tpu.dot_dimension_numbers<[1], [0], [0], [1], [0, 0, 1, 1], [], []>} : vector<24x64xbf16>, vector<64x32xbf16>, vector<24x32xf32> -> vector<24x32xf32>
    %c0_10 = arith.constant 0 : index
    %c0_11 = arith.constant 0 : index
    %13 = vector.load %arg5[%c0_10, %c0_11] : memref<1x32xf32, #tpu.memory_space<vmem>>, vector<1x32xf32>
    %14 = vector.broadcast %13 : vector<1x32xf32> to vector<24x32xf32>
    %15 = arith.addf %12, %14 : vector<24x32xf32>
    %cst_12 = arith.constant 0.000000e+00 : f32
    %16 = vector.broadcast %cst_12 : f32 to vector<24x32xf32>
    %17 = arith.maximumf %15, %16 : vector<24x32xf32>
    %18 = arith.truncf %17 : vector<24x32xf32> to vector<24x32xbf16>
    %c0_13 = arith.constant 0 : index
    %c0_14 = arith.constant 0 : index
    %19 = vector.load %arg6[%c0_13, %c0_14] : memref<32x16xbf16, #tpu.memory_space<vmem>>, vector<32x16xbf16>
    %cst_15 = arith.constant dense<0.000000e+00> : vector<24x16xf32>
    %20 = tpu.matmul %18, %19, %cst_15 {dimension_numbers = #tpu.dot_dimension_numbers<[1], [0], [0], [1], [0, 0, 1, 1], [], []>} : vector<24x32xbf16>, vector<32x16xbf16>, vector<24x16xf32> -> vector<24x16xf32>
    %c0_16 = arith.constant 0 : index
    %c0_17 = arith.constant 0 : index
    %21 = vector.load %arg7[%c0_16, %c0_17] : memref<1x16xf32, #tpu.memory_space<vmem>>, vector<1x16xf32>
    %22 = vector.broadcast %21 : vector<1x16xf32> to vector<24x16xf32>
    %23 = arith.addf %20, %22 : vector<24x16xf32>
    %cst_18 = arith.constant 0.000000e+00 : f32
    %24 = vector.broadcast %cst_18 : f32 to vector<24x16xf32>
    %25 = arith.maximumf %23, %24 : vector<24x16xf32>
    %26 = vector.extract_strided_slice %25 {offsets = [0, 0], sizes = [8, 16], strides = [1, 1]} : vector<24x16xf32> to vector<8x16xf32>
    %27 = arith.truncf %26 : vector<8x16xf32> to vector<8x16xbf16>
    %c0_19 = arith.constant 0 : index
    %c0_20 = arith.constant 0 : index
    %c0_21 = arith.constant 0 : index
    %28 = vector.load %arg8[%c0_19, %c0_20, %c0_21] : memref<3x16x128xbf16, #tpu.memory_space<vmem>>, vector<1x16x128xbf16>
    %29 = vector.shape_cast %28 : vector<1x16x128xbf16> to vector<16x128xbf16>
    %cst_22 = arith.constant dense<0.000000e+00> : vector<8x128xf32>
    %30 = tpu.matmul %27, %29, %cst_22 {dimension_numbers = #tpu.dot_dimension_numbers<[1], [0], [0], [1], [0, 0, 1, 1], [], []>} : vector<8x16xbf16>, vector<16x128xbf16>, vector<8x128xf32> -> vector<8x128xf32>
    %c0_23 = arith.constant 0 : index
    %c0_24 = arith.constant 0 : index
    %c0_25 = arith.constant 0 : index
    %31 = vector.load %arg9[%c0_23, %c0_24, %c0_25] : memref<3x1x128xf32, #tpu.memory_space<vmem>>, vector<1x1x128xf32>
    %32 = vector.shape_cast %31 : vector<1x1x128xf32> to vector<1x128xf32>
    %33 = vector.broadcast %32 : vector<1x128xf32> to vector<8x128xf32>
    %34 = arith.addf %30, %33 : vector<8x128xf32>
    %c0_26 = arith.constant 0 : index
    %c0_27 = arith.constant 0 : index
    %c0_28 = arith.constant 0 : index
    %35 = vector.load %arg10[%c0_26, %c0_27, %c0_28] : memref<3x8x128xf32, #tpu.memory_space<vmem>>, vector<1x8x128xf32>
    %36 = vector.shape_cast %35 : vector<1x8x128xf32> to vector<8x128xf32>
    %37 = vector.shape_cast %34 : vector<8x128xf32> to vector<1x8x128xf32>
    tpu.vector_store %arg10[%c0_26, %c0_27, %c0_28], %37 {strides = array<i32>} : memref<3x8x128xf32, #tpu.memory_space<vmem>>, vector<1x8x128xf32>,
    %38 = vector.extract_strided_slice %25 {offsets = [8, 0], sizes = [8, 16], strides = [1, 1]} : vector<24x16xf32> to vector<8x16xf32>
    %39 = arith.truncf %38 : vector<8x16xf32> to vector<8x16xbf16>
    %c1 = arith.constant 1 : index
    %c0_29 = arith.constant 0 : index
    %c0_30 = arith.constant 0 : index
    %40 = vector.load %arg8[%c1, %c0_29, %c0_30] : memref<3x16x128xbf16, #tpu.memory_space<vmem>>, vector<1x16x128xbf16>
    %41 = vector.shape_cast %40 : vector<1x16x128xbf16> to vector<16x128xbf16>
    %cst_31 = arith.constant dense<0.000000e+00> : vector<8x128xf32>
    %42 = tpu.matmul %39, %41, %cst_31 {dimension_numbers = #tpu.dot_dimension_numbers<[1], [0], [0], [1], [0, 0, 1, 1], [], []>} : vector<8x16xbf16>, vector<16x128xbf16>, vector<8x128xf32> -> vector<8x128xf32>
    %c1_32 = arith.constant 1 : index
    %c0_33 = arith.constant 0 : index
    %c0_34 = arith.constant 0 : index
    %43 = vector.load %arg9[%c1_32, %c0_33, %c0_34] : memref<3x1x128xf32, #tpu.memory_space<vmem>>, vector<1x1x128xf32>
    %44 = vector.shape_cast %43 : vector<1x1x128xf32> to vector<1x128xf32>
    %45 = vector.broadcast %44 : vector<1x128xf32> to vector<8x128xf32>
    %46 = arith.addf %42, %45 : vector<8x128xf32>
    %c1_35 = arith.constant 1 : index
    %c0_36 = arith.constant 0 : index
    %c0_37 = arith.constant 0 : index
    %47 = vector.load %arg10[%c1_35, %c0_36, %c0_37] : memref<3x8x128xf32, #tpu.memory_space<vmem>>, vector<1x8x128xf32>
    %48 = vector.shape_cast %47 : vector<1x8x128xf32> to vector<8x128xf32>
    %49 = vector.shape_cast %46 : vector<8x128xf32> to vector<1x8x128xf32>
    tpu.vector_store %arg10[%c1_35, %c0_36, %c0_37], %49 {strides = array<i32>} : memref<3x8x128xf32, #tpu.memory_space<vmem>>, vector<1x8x128xf32>,
    %50 = vector.extract_strided_slice %25 {offsets = [16, 0], sizes = [8, 16], strides = [1, 1]} : vector<24x16xf32> to vector<8x16xf32>
    %51 = arith.truncf %50 : vector<8x16xf32> to vector<8x16xbf16>
    %c2 = arith.constant 2 : index
    %c0_38 = arith.constant 0 : index
    %c0_39 = arith.constant 0 : index
    %52 = vector.load %arg8[%c2, %c0_38, %c0_39] : memref<3x16x128xbf16, #tpu.memory_space<vmem>>, vector<1x16x128xbf16>
    %53 = vector.shape_cast %52 : vector<1x16x128xbf16> to vector<16x128xbf16>
    %cst_40 = arith.constant dense<0.000000e+00> : vector<8x128xf32>
    %54 = tpu.matmul %51, %53, %cst_40 {dimension_numbers = #tpu.dot_dimension_numbers<[1], [0], [0], [1], [0, 0, 1, 1], [], []>} : vector<8x16xbf16>, vector<16x128xbf16>, vector<8x128xf32> -> vector<8x128xf32>
    %c2_41 = arith.constant 2 : index
    %c0_42 = arith.constant 0 : index
    %c0_43 = arith.constant 0 : index
    %55 = vector.load %arg9[%c2_41, %c0_42, %c0_43] : memref<3x1x128xf32, #tpu.memory_space<vmem>>, vector<1x1x128xf32>
    %56 = vector.shape_cast %55 : vector<1x1x128xf32> to vector<1x128xf32>
    %57 = vector.broadcast %56 : vector<1x128xf32> to vector<8x128xf32>
    %58 = arith.addf %54, %57 : vector<8x128xf32>
    %c2_44 = arith.constant 2 : index
    %c0_45 = arith.constant 0 : index
    %c0_46 = arith.constant 0 : index
    %59 = vector.load %arg10[%c2_44, %c0_45, %c0_46] : memref<3x8x128xf32, #tpu.memory_space<vmem>>, vector<1x8x128xf32>
    %60 = vector.shape_cast %59 : vector<1x8x128xf32> to vector<8x128xf32>
    %61 = vector.shape_cast %58 : vector<8x128xf32> to vector<1x8x128xf32>
    tpu.vector_store %arg10[%c2_44, %c0_45, %c0_46], %61 {strides = array<i32>} : memref<3x8x128xf32, #tpu.memory_space<vmem>>, vector<1x8x128xf32>,
    return
  }
  func.func @transform_0(%arg0: i32) -> (i32, i32, i32) {
    %c0_i32 = arith.constant 0 : i32
    %c0_i32_0 = arith.constant 0 : i32
    %c0_i32_1 = arith.constant 0 : i32
    return %c0_i32, %arg0, %c0_i32_0 : i32, i32, i32
  }
  func.func @transform_1(%arg0: i32) -> (i32, i32) {
    %c0_i32 = arith.constant 0 : i32
    %c0_i32_0 = arith.constant 0 : i32
    %c0_i32_1 = arith.constant 0 : i32
    return %c0_i32, %c0_i32_0 : i32, i32
  }
  func.func @transform_2(%arg0: i32) -> (i32, i32) {
    %c0_i32 = arith.constant 0 : i32
    %c0_i32_0 = arith.constant 0 : i32
    %c0_i32_1 = arith.constant 0 : i32
    return %c0_i32, %c0_i32_0 : i32, i32
  }
  func.func @transform_3(%arg0: i32) -> (i32, i32) {
    %c0_i32 = arith.constant 0 : i32
    %c0_i32_0 = arith.constant 0 : i32
    %c0_i32_1 = arith.constant 0 : i32
    return %c0_i32, %c0_i32_0 : i32, i32
  }
  func.func @transform_4(%arg0: i32) -> (i32, i32) {
    %c0_i32 = arith.constant 0 : i32
    %c0_i32_0 = arith.constant 0 : i32
    %c0_i32_1 = arith.constant 0 : i32
    return %c0_i32, %c0_i32_0 : i32, i32
  }
  func.func @transform_5(%arg0: i32) -> (i32, i32) {
    %c0_i32 = arith.constant 0 : i32
    %c0_i32_0 = arith.constant 0 : i32
    %c0_i32_1 = arith.constant 0 : i32
    return %c0_i32, %c0_i32_0 : i32, i32
  }
  func.func @transform_6(%arg0: i32) -> (i32, i32) {
    %c0_i32 = arith.constant 0 : i32
    %c0_i32_0 = arith.constant 0 : i32
    %c0_i32_1 = arith.constant 0 : i32
    return %c0_i32, %c0_i32_0 : i32, i32
  }
  func.func @transform_7(%arg0: i32) -> (i32, i32, i32) {
    %c0_i32 = arith.constant 0 : i32
    %c0_i32_0 = arith.constant 0 : i32
    %c0_i32_1 = arith.constant 0 : i32
    %c0_i32_2 = arith.constant 0 : i32
    return %c0_i32, %c0_i32_0, %c0_i32_1 : i32, i32, i32
  }
  func.func @transform_8(%arg0: i32) -> (i32, i32, i32) {
    %c0_i32 = arith.constant 0 : i32
    %c0_i32_0 = arith.constant 0 : i32
    %c0_i32_1 = arith.constant 0 : i32
    %c0_i32_2 = arith.constant 0 : i32
    return %c0_i32, %c0_i32_0, %c0_i32_1 : i32, i32, i32
  }
  func.func @transform_9(%arg0: i32) -> (i32, i32, i32) {
    %c0_i32 = arith.constant 0 : i32
    %c0_i32_0 = arith.constant 0 : i32
    %c0_i32_1 = arith.constant 0 : i32
    return %c0_i32, %arg0, %c0_i32_0 : i32, i32, i32
  }
}

</mosaic_0001>

<bundles_post_ra>
// kernel: mtlnet_3shared_forward.1
= control target key start
LH: loop header
LB: loop body
LE: loop exit
PB: predicated region body
PF: predicated region fallthrough
CT: control target
= control target key end

     0   :  { %vm62_vm0 = vcmask 261120   ;;  %s776_s0 = inlined_call_operand.vmem [shape: f32[3,8,32], index: 0, kind: input, shape index: {}]   ;;  %s777_s1 = inlined_call_operand.vmem [shape: bf16[32,64], index: 1, kind: input, shape index: {}]   ;;  %s778_s2 = inlined_call_operand.vmem [shape: f32[1,64], index: 2, kind: input, shape index: {}]   ;;  %s779_s3 = inlined_call_operand.vmem [shape: bf16[64,32], index: 3, kind: input, shape index: {}]   ;;  %s780_s4 = inlined_call_operand.vmem [shape: f32[1,32], index: 4, kind: input, shape index: {}]   ;;  %s781_s5 = inlined_call_operand.vmem [shape: bf16[32,16], index: 5, kind: input, shape index: {}]   ;;  %s782_s6 = inlined_call_operand.vmem [shape: f32[1,16], index: 6, kind: input, shape index: {}]   ;;  %s783_s7 = inlined_call_operand.vmem [shape: bf16[3,16,128], index: 7, kind: input, shape index: {}]   ;;  %s784_s8 = inlined_call_operand.vmem [shape: f32[3,1,128], index: 8, kind: input, shape index: {}]   ;;  %s785_s9 = inlined_call_operand.hbm [shape: f32[3,8,128], index: 9, kind: output, shape index: {}]  }
   0x1   :  { %v607_v0 = vld [vmem:[%s777_s1] sm:$0xff]   ;;  %v608_v1 = vld [vmem:[%s777_s1 + $0x8] sm:$0xff]   ;;  %v36_v4 = vld [vmem:[%s776_s0 + $0x10] sm:$0xff] }
   0x2   :  { %556 = vmatprep.subr.bf16.mxu0 %v607_v0  ;;  %v34_v2 = vld [vmem:[%s776_s0] sm:$0xff]  ;;  %v35_v3 = vld [vmem:[%s776_s0 + $0x8] sm:$0xff]  ;;  %v38_v8 = vpack.c.bf16 %v36_v4, %v36_v4 }
   0x3   :  { %557 = vmatpush3.bf16.msra.mxu0 %v607_v0  ;;  %v37_v5 = vpack.c.bf16 %v35_v3, %v34_v2  ;;  %v609_v6 = vld [vmem:[%s779_s3] sm:$0xff]   ;;  %v610_v7 = vld [vmem:[%s779_s3 + $0x8] sm:$0xff]  }
   0x4   :  { %558 = vmatprep.subr.bf16.mxu0 %v608_v1  ;;  %564 = vmatprep.subr.bf16.mxu1 %v609_v6 }
   0x5   :  { %560 = vmatprep.mubr.msk.bf16.mxu0 %vm62_vm0, %v37_v5  ;;  %565 = vmatpush3.bf16.msra.mxu1 %v609_v6 }
   0x6   :  { %566 = vmatprep.subr.bf16.mxu1 %v610_v7 }
   0x7   :  { %559 = vmatpush3.bf16.msra.mxu0 %v608_v1 }
   0x8   :  { %14 = vsyncpa [#allocation3], 0  ;;  %v611_v9 = vld [vmem:[%s779_s3 + $0x10] sm:$0xff]   ;;  %v612_v10 = vld [vmem:[%s779_s3 + $0x18] sm:$0xff]   ;;  %vm161_vm1 = vcmask 523264   ;;  %v642_v26 = vmov 0.0  }
   0x9   :  { %567 = vmatpush3.bf16.msra.mxu1 %v610_v7  ;;  %v504_v11 = vld [vmem:[%s778_s2] ss:$0 sm:$0xff]  ;;  %v614_v25 = vld [vmem:[%s781_s5 + $0x8] sm:$0xff]   ;;  %vm643_vm2 = vmmov 0   ;;  %vm317_vm3 = vcmask 130048   ;;  %v617_v50 = vld [vmem:[%s783_s7 + $0x10] sm:$0xff]  }
   0xa   :  { %561 = vmatmul.mubr.msk.bf16.vlgmr.msra.gmra.mrb[0].mxu0 %vm62_vm0, %v38_v8  ;;  %568 = vmatprep.subr.bf16.mxu1 %v611_v9  ;;  %v613_v24 = vld [vmem:[%s781_s5] sm:$0xff]   ;;  %v616_v41 = vld [vmem:[%s783_s7 + $0x8] sm:$0xff]  }
   0xb   :  { %576 = vmatprep.subr.bf16.mxu0 %v613_v24  ;;  %v509_v27 = vld [vmem:[%s780_s4] ss:$0 sm:$0xff]  ;;  %v527_v59 = vld [vmem:[%s784_s8 + $0x1] ss:$0 sm:$0xff]  ;;  %v533_v5 = vld [vmem:[%s784_s8 + $0x2] ss:$0 sm:$0xff] }
   0xc   :  { %577 = vmatpush3.bf16.msra.mxu0 %v613_v24  ;;  %v615_v40 = vld [vmem:[%s783_s7] sm:$0xff]   ;;  %s644_s7 = smov [#allocation2]  }
   0xd   :  { %569 = vmatpush3.bf16.msra.mxu1 %v611_v9  ;;  %578 = vmatprep.subr.bf16.mxu0 %v614_v25  ;;  %v516_v42 = vld [vmem:[%s782_s6] ss:$0 sm:$0xff]  ;;  %s493_s19 = sshll.u32 %s644_s7, 4  ;;  %s494_s19 = int_to_ptr.vmem [resolvable:$true] %s493_s19 }
   0xe   :  { %570 = vmatprep.subr.bf16.mxu1 %v612_v10  ;;  %v521_v57 = vld [vmem:[%s784_s8] ss:$0 sm:$0xff]  ;;  %s618_s21 = scalar_lea.vmem %s494_s19, 384  ;;  %p623_p1 = scmp.lt.s32.totalorder %s494_s19, %s494_s19 }
   0xf   :  { %p619_p0 = scmp.ne.s32.totalorder %s494_s19, %s618_s21  ;;  %p624_p2 = scmp.lt.s32.totalorder %s618_s21, %s618_s21 }
  0x10   :  { %579 = vmatpush3.bf16.msra.mxu0 %v614_v25 }
  0x11   :  { %571 = vmatpush3.bf16.msra.mxu1 %v612_v10  ;;  %584 = vmatprep.subr.bf16.mxu0 %v642_v26  ;;  %p625_p3 = por %p624_p2, %p623_p1 }
  0x12   :  { %590 = vmatprep.subr.bf16.mxu1 %v642_v26 }
  0x13   :  { %p626_p4 = pnand %p625_p3, %p619_p0 }
  0xdd   :  { %v562_v12 = vpop.f32.mrb[0].mxu0 }
  0xde   :  { %v112_v13 = vadd.f32 %v562_v12, %v504_v11  ;;  %v103_v14 = vpop.f32.mrb[1].mxu0 }
  0xdf   :  { %v104_v15 = vadd.f32 %v504_v11, %v103_v14  ;;  %v563_v16 = vpop.f32.mrb[2].mxu0 }
  0xe0   :  { %v106_v17 = vpop.f32.mrb[3].mxu0  ;;  %v119_v19 = vmax.f32 %v112_v13, 0.0 }
  0xe1   :  { %v107_v18 = vadd.f32 %v504_v11, %v106_v17  ;;  %v117_v20 = vmax.f32 %v104_v15, 0.0 }
  0xe2   :  { %v121_v23 = vpack.c.bf16 %v119_v19, %v119_v19 }
  0xe3   :  { %v118_v21 = vmax.f32 %v107_v18, 0.0 }
  0xe5   :  { %v120_v22 = vpack.c.bf16 %v118_v21, %v117_v20 }
  0xe7   :  { %572 = vmatprep.mubr.msk.bf16.mxu1 %vm161_vm1, %v120_v22 }
  0xe8   :  { %573 = vmatmul.mubr.msk.bf16.vlgmr.msra.gmra.mrb[0].mxu1 %vm161_vm1, %v121_v23 }
  0xe9   :  { %591 = vmatpush3.bf16.msra.mxu1 %v616_v41  ;;  %592 = vmatprep.mubr.msk.bf16.mxu1 %vm643_vm2, %v642_v26 }
 0x1bb   :  { %v574_v28 = vpop.f32.mrb[0].mxu1 }
 0x1bc   :  { %v211_v29 = vadd.f32 %v574_v28, %v509_v27  ;;  %v202_v30 = vpop.f32.mrb[1].mxu1 }
 0x1bd   :  { %v203_v31 = vadd.f32 %v509_v27, %v202_v30  ;;  %v575_v32 = vpop.f32.mrb[2].mxu1 }
 0x1be   :  { %v205_v33 = vpop.f32.mrb[3].mxu1  ;;  %v218_v35 = vmax.f32 %v211_v29, 0.0 }
 0x1bf   :  { %v206_v34 = vadd.f32 %v509_v27, %v205_v33  ;;  %v216_v36 = vmax.f32 %v203_v31, 0.0 }
 0x1c0   :  { %v220_v39 = vpack.c.bf16 %v218_v35, %v218_v35 }
 0x1c1   :  { %v217_v37 = vmax.f32 %v206_v34, 0.0 }
 0x1c3   :  { %v219_v38 = vpack.c.bf16 %v217_v37, %v216_v36 }
 0x1c5   :  { %580 = vmatprep.mubr.msk.bf16.mxu0 %vm62_vm0, %v219_v38 }
 0x1c6   :  { %581 = vmatmul.mubr.msk.bf16.vlgmr.msra.gmra.mrb[4].mxu0 %vm62_vm0, %v220_v39 }
 0x1c7   :  { %585 = vmatpush3.bf16.msra.mxu0 %v615_v40  ;;  %586 = vmatprep.mubr.msk.bf16.mxu0 %vm643_vm2, %v642_v26 }
 0x1c8   :  { %596 = vmatprep.subr.bf16.mxu0 %v642_v26 }
 0x299   :  { %v582_v43 = vpop.f32.mrb[4].mxu0 }
 0x29a   :  { %v284_v44 = vpop.f32.mrb[5].mxu0  ;;  %v293_v51 = vadd.f32 %v582_v43, %v516_v42 }
 0x29b   :  { %v285_v45 = vadd.f32 %v516_v42, %v284_v44  ;;  %v583_v46 = vpop.f32.mrb[6].mxu0 }
 0x29c   :  { %v287_v47 = vpop.f32.mrb[7].mxu0  ;;  %v300_v55 = vmax.f32 %v293_v51, 0.0 }
 0x29d   :  { %v298_v48 = vmax.f32 %v285_v45, 0.0  ;;  %v288_v49 = vadd.f32 %v516_v42, %v287_v47 }
 0x29e   :  { %v425_v56 = vpack.c.bf16 %v300_v55, %v300_v55 }
 0x29f   :  { %v301_v52 = vpack.c.bf16 %v298_v48, %v298_v48  ;;  %v299_v53 = vmax.f32 %v288_v49, 0.0 }
 0x2a1   :  { %v362_v54 = vpack.c.bf16 %v299_v53, %v299_v53  ;;  %587 = vmatmul.mubr.msk.bf16.vlgmr.msra.gmra.mrb[8].mxu0 %vm317_vm3, %v301_v52 }
 0x2a2   :  { %597 = vmatpush3.bf16.msra.mxu0 %v617_v50  ;;  %598 = vmatprep.mubr.msk.bf16.mxu0 %vm643_vm2, %v642_v26 }
 0x2a3   :  { %593 = vmatmul.mubr.msk.bf16.vlgmr.msra.gmra.mrb[4].mxu1 %vm317_vm3, %v362_v54 }
 0x2a9   :  { %599 = vmatmul.mubr.msk.bf16.vlgmr.msra.gmra.mrb[12].mxu0 %vm317_vm3, %v425_v56 }
 0x374   :  { %v355_v58 = vpop.f32.mrb[8].mxu0 }
 0x375   :  { %v356_v60 = vadd.f32 %v521_v57, %v355_v58  ;;  %v588_v61 = vpop.f32.mrb[9].mxu0 }
 0x376   :  { %v358_v62 = vpop.f32.mrb[10].mxu0  ;;  %v417_v63 = vpop.f32.mrb[4].mxu1 }
 0x377   :  { %361 = vst [vmem:[#allocation2] sm:$0xff] %v356_v60  ;;  %v418_v0 = vadd.f32 %v527_v59, %v417_v63  ;;  %v589_v1 = vpop.f32.mrb[11].mxu0  ;;  %v594_v2 = vpop.f32.mrb[5].mxu1 }
 0x378   :  { %v420_v3 = vpop.f32.mrb[6].mxu1 }
 0x379   :  { %424 = vst [vmem:[#allocation2 + $0x8] sm:$0xff] %v418_v0  ;;  %v595_v4 = vpop.f32.mrb[7].mxu1 }
 0x37c   :  { %v480_v6 = vpop.f32.mrb[12].mxu0 }
 0x37d   :  { %v481_v7 = vadd.f32 %v533_v5, %v480_v6  ;;  %v600_v8 = vpop.f32.mrb[13].mxu0 }
 0x37e   :  { %v483_v9 = vpop.f32.mrb[14].mxu0 }
 0x37f   :  { %487 = vst [vmem:[#allocation2 + $0x10] sm:$0xff] %v481_v7  ;;  %v601_v10 = vpop.f32.mrb[15].mxu0 }
 0x380   :  { %629 = shalt.err (!%p626_p4)
}
 0x381   :  { %s630_s23 = scalar_lea.hbm %s785_s9, 384 }
 0x382   :  { %p631_p5 = scmp.ne.s32.totalorder %s785_s9, %s630_s23  ;;  %p634_p6 = scmp.lt.u32.totalorder %s630_s23, %s785_s9 }
 0x384   :  { %p636_p7 = pnand %p634_p6, %p631_p5 }
 0x386   :  { %639 = shalt.err (!%p636_p7)
}
 0x387   :  { %s645_s3 = smov 128   ;;  %s646_s27 = smov 8  }
 0x388   :  { %499 = dma.vmem_to_hbm [thread:$0]  %s494_s19, 384, %s785_s9, [#allocation3], %s645_s3, %s645_s3, %s646_s27  }
 0x389   :  { %640 = dma.done.wait [#allocation3], 384  }
 0x38a   :  { %641 = vsyncadd [#allocation3], 4294966912 }
 0x38b   :  { %503 = vsyncpa [#allocation3], 1 }

</bundles_post_ra>
